<compile_context>
chip_gen: v7x
topology: tpu7x:2x2x1
jax: 0.10.0
libtpu: 0.0.40
codegen_flags: <defaults>
</compile_context>

<pallas_src>
import jax
import jax.numpy as jnp
from jax.experimental import pallas as pl
from jax.experimental.pallas import tpu as pltpu

_LANE = 128
_SUBLANE = 8


def _round_up(x, m):
    return (x + m - 1) // m * m


def _autoencoder_kernel(x_ref,
                        w1_ref, b1_ref,
                        w2_ref, b2_ref,
                        w3_ref, b3_ref,
                        w4_ref, b4_ref,
                        enc_ref, dec_ref):
    x = x_ref[...]
    # Hoist bias loads once per grid step.
    b1 = b1_ref[...]
    b2 = b2_ref[...]
    b3 = b3_ref[...]
    b4 = b4_ref[...]

    # encoder: Linear -> ReLU -> Linear -> ReLU   (f32 accumulation on MXU)
    h1 = jnp.dot(x, w1_ref[...], preferred_element_type=jnp.float32) + b1
    h1 = jnp.maximum(h1, 0.0)
    enc = jnp.dot(h1.astype(w2_ref.dtype), w2_ref[...],
                  preferred_element_type=jnp.float32) + b2
    enc = jnp.maximum(enc, 0.0)

    # decoder: Linear -> ReLU -> Linear -> Sigmoid
    h2 = jnp.dot(enc.astype(w3_ref.dtype), w3_ref[...],
                 preferred_element_type=jnp.float32) + b3
    h2 = jnp.maximum(h2, 0.0)
    logits = jnp.dot(h2.astype(w4_ref.dtype), w4_ref[...],
                     preferred_element_type=jnp.float32) + b4
    dec = jax.nn.sigmoid(logits)

    enc_ref[...] = enc.astype(enc_ref.dtype)
    dec_ref[...] = dec.astype(dec_ref.dtype)


def autoencoder_forward(x, params, *, batch_tile=None, storage_dtype=None,
                        vmem_budget_bytes=48 * 1024 * 1024):
    """Autoencoder forward pass as a single Pallas kernel.

    x: (B, input_size) float array.
    params: dict of w1,b1,w2,b2,w3,b3,w4,b4 with weights stored (in, out),
            biases stored (1, out).
    storage_dtype: optional dtype (e.g. jnp.bfloat16) used for the streamed
            x / weight tiles; accumulation stays in f32.
    Returns (encoded (B, enc_dim), decoded (B, input_size)) in x.dtype.
    """
    B, input_size = x.shape
    out_dtype = x.dtype
    w1, b1, w2, b2, w3, b3, w4, b4 = (params[k] for k in
                                      ("w1", "b1", "w2", "b2", "w3", "b3", "w4", "b4"))
    hidden = w1.shape[1]
    enc_dim = w2.shape[1]

    st = jnp.dtype(storage_dtype) if storage_dtype is not None else jnp.dtype(out_dtype)
    bytes_per = st.itemsize

    # --- pad feature dims to lane multiples (zero padding keeps math exact) ---
    in_p = _round_up(input_size, _LANE)
    hid_p = _round_up(hidden, _LANE)
    enc_p = _round_up(enc_dim, _LANE)

    def pad_w(w, rows, cols):
        return jnp.pad(w, ((0, rows - w.shape[0]), (0, cols - w.shape[1]))).astype(st)

    def pad_b(b, cols):
        return jnp.pad(b, ((0, 0), (0, cols - b.shape[1]))).astype(st)

    w1p, b1p = pad_w(w1, in_p, hid_p), pad_b(b1, hid_p)
    w2p, b2p = pad_w(w2, hid_p, enc_p), pad_b(b2, enc_p)
    w3p, b3p = pad_w(w3, enc_p, hid_p), pad_b(b3, hid_p)
    w4p, b4p = pad_w(w4, hid_p, in_p), pad_b(b4, in_p)

    # --- choose a batch tile (multiple of 8) within the VMEM budget ---
    weight_bytes = 2 * bytes_per * (in_p * hid_p + hid_p * enc_p + enc_p * hid_p
                                    + hid_p * in_p + 2 * hid_p + enc_p + in_p)
    per_row = 2 * bytes_per * (in_p + enc_p + in_p)   # double-buffered x/enc/dec streams
    per_row += 4 * 4 * hid_p                          # f32 intermediates (approx)
    avail = max(vmem_budget_bytes - weight_bytes, per_row * _SUBLANE)
    tm_max = max(_SUBLANE, (avail // per_row) // _SUBLANE * _SUBLANE)

    if batch_tile is None:
        tm = min(512, _round_up(B, _SUBLANE))
    else:
        tm = _round_up(int(batch_tile), _SUBLANE)
    tm = max(_SUBLANE, min(tm, tm_max))

    # Pad the batch so any tile size works (tail handled by zero padding).
    Bp = _round_up(B, tm)
    grid = (Bp // tm,)

    xp = jnp.pad(x, ((0, Bp - B), (0, in_p - input_size))).astype(st)

    est_vmem = weight_bytes + per_row * tm + (2 << 20)
    vmem_limit = int(min(max(2 * est_vmem, 32 << 20), vmem_budget_bytes))

    def x_map(i):
        return (i, 0)

    def full_map(i):
        return (0, 0)

    weight_specs = [pl.BlockSpec(a.shape, full_map)
                    for a in (w1p, b1p, w2p, b2p, w3p, b3p, w4p, b4p)]

    out_shapes = (
        jax.ShapeDtypeStruct((Bp, enc_p), out_dtype),
        jax.ShapeDtypeStruct((Bp, in_p), out_dtype),
    )
    out_specs = [
        pl.BlockSpec((tm, enc_p), x_map),
        pl.BlockSpec((tm, in_p), x_map),
    ]

    fn = pl.pallas_call(
        _autoencoder_kernel,
        out_shape=out_shapes,
        grid_spec=pltpu.PrefetchScalarGridSpec(
            num_scalar_prefetch=0,
            grid=grid,
            in_specs=[pl.BlockSpec((tm, in_p), x_map)] + weight_specs,
            out_specs=out_specs,
        ),
        compiler_params=pltpu.CompilerParams(
            dimension_semantics=("parallel",),
            vmem_limit_bytes=vmem_limit),
    )
    enc_p_out, dec_p_out = fn(xp, w1p, b1p, w2p, b2p, w3p, b3p, w4p, b4p)

    # Strip batch- and feature-padding.
    return enc_p_out[:B, :enc_dim], dec_p_out[:B, :input_size]


def init_params(key, input_size, encoding_dim, hidden=128, dtype=jnp.float32):
    """Deterministic synthetic parameters; weights stored (in, out)."""
    ks = jax.random.split(key, 8)

    def lin(kw, kb, fan_in, fan_out):
        bound = 1.0 / jnp.sqrt(jnp.asarray(fan_in, dtype))
        w = jax.random.uniform(kw, (fan_in, fan_out), dtype, -bound, bound)
        b = jax.random.uniform(kb, (1, fan_out), dtype, -bound, bound)
        return w, b

    w1, b1 = lin(ks[0], ks[1], input_size, hidden)
    w2, b2 = lin(ks[2], ks[3], hidden, encoding_dim)
    w3, b3 = lin(ks[4], ks[5], encoding_dim, hidden)
    w4, b4 = lin(ks[6], ks[7], hidden, input_size)
    return dict(w1=w1, b1=b1, w2=w2, b2=b2, w3=w3, b3=b3, w4=w4, b4=b4)


def _reference_forward(x, p):
    h1 = jnp.maximum(x @ p["w1"] + p["b1"], 0.0)
    enc = jnp.maximum(h1 @ p["w2"] + p["b2"], 0.0)
    h2 = jnp.maximum(enc @ p["w3"] + p["b3"], 0.0)
    dec = jax.nn.sigmoid(h2 @ p["w4"] + p["b4"])
    return enc, dec


if __name__ == "__main__":
    key = jax.random.PRNGKey(0)
    k_x, k_p, k_x2 = jax.random.split(key, 3)

    # Small shapes consistent with the module.
    batch, input_size, encoding_dim = 8, 64, 32
    x = jax.random.normal(k_x, (batch, input_size), jnp.float32)
    params = init_params(k_p, input_size, encoding_dim)

    encoded, decoded = autoencoder_forward(x, params)
    jax.block_until_ready((encoded, decoded))
    enc_ref, dec_ref = _reference_forward(x, params)
    assert encoded.shape == (batch, encoding_dim)
    assert decoded.shape == (batch, input_size)
    assert jnp.allclose(encoded, enc_ref, atol=1e-5, rtol=1e-5)
    assert jnp.allclose(decoded, dec_ref, atol=1e-5, rtol=1e-5)

    # Larger, non-divisible batch: exercises real tiling (grid=(3,)) and the
    # batch tail-padding path.
    B2 = 600
    x2 = jax.random.normal(k_x2, (B2, input_size), jnp.float32)
    enc2, dec2 = autoencoder_forward(x2, params, batch_tile=256)
    jax.block_until_ready((enc2, dec2))
    enc2_ref, dec2_ref = _reference_forward(x2, params)
    assert jnp.allclose(enc2, enc2_ref, atol=1e-5, rtol=1e-5)
    assert jnp.allclose(dec2, dec2_ref, atol=1e-5, rtol=1e-5)

    # bf16 storage path (halves streamed HBM bytes); f32 accumulation, loose check.
    enc3, dec3 = autoencoder_forward(x2, params, batch_tile=256,
                                     storage_dtype=jnp.bfloat16)
    jax.block_until_ready((enc3, dec3))
    assert jnp.allclose(enc3, enc2_ref, atol=1e-1, rtol=1e-1)
    assert jnp.allclose(dec3, dec2_ref, atol=1e-1, rtol=1e-1)

    print("KERNEL_OK")
</pallas_src>

<mosaic_0001>
module attributes {stable_mosaic.version = 11 : i64} {
  func.func @_autoencoder_kernel(%arg0: i32, %arg1: memref<8x128xf32, #tpu.memory_space<vmem>>, %arg2: memref<128x128xf32, #tpu.memory_space<vmem>>, %arg3: memref<1x128xf32, #tpu.memory_space<vmem>>, %arg4: memref<128x128xf32, #tpu.memory_space<vmem>>, %arg5: memref<1x128xf32, #tpu.memory_space<vmem>>, %arg6: memref<128x128xf32, #tpu.memory_space<vmem>>, %arg7: memref<1x128xf32, #tpu.memory_space<vmem>>, %arg8: memref<128x128xf32, #tpu.memory_space<vmem>>, %arg9: memref<1x128xf32, #tpu.memory_space<vmem>>, %arg10: memref<8x128xf32, #tpu.memory_space<vmem>>, %arg11: memref<8x128xf32, #tpu.memory_space<vmem>>) attributes {dimension_semantics = [#tpu.dimension_semantics<parallel>], iteration_bounds = array<i64: 1>, scalar_prefetch = 0 : i64, scratch_operands = 0 : i64, tpu.core_type = #tpu.core_type<tc>, window_params = [{transform_indices = @transform_0, window_bounds = array<i64: 8, 128>}, {pipeline_mode = #tpu.pipeline_mode<synchronous>, transform_indices = @transform_1, window_bounds = array<i64: 128, 128>}, {pipeline_mode = #tpu.pipeline_mode<synchronous>, transform_indices = @transform_2, window_bounds = array<i64: 1, 128>}, {pipeline_mode = #tpu.pipeline_mode<synchronous>, transform_indices = @transform_3, window_bounds = array<i64: 128, 128>}, {pipeline_mode = #tpu.pipeline_mode<synchronous>, transform_indices = @transform_4, window_bounds = array<i64: 1, 128>}, {pipeline_mode = #tpu.pipeline_mode<synchronous>, transform_indices = @transform_5, window_bounds = array<i64: 128, 128>}, {pipeline_mode = #tpu.pipeline_mode<synchronous>, transform_indices = @transform_6, window_bounds = array<i64: 1, 128>}, {pipeline_mode = #tpu.pipeline_mode<synchronous>, transform_indices = @transform_7, window_bounds = array<i64: 128, 128>}, {pipeline_mode = #tpu.pipeline_mode<synchronous>, transform_indices = @transform_8, window_bounds = array<i64: 1, 128>}, {transform_indices = @transform_9, window_bounds = array<i64: 8, 128>}, {transform_indices = @transform_10, window_bounds = array<i64: 8, 128>}]} {
    %c0 = arith.constant 0 : index
    %c0_0 = arith.constant 0 : index
    %0 = vector.load %arg1[%c0, %c0_0] : memref<8x128xf32, #tpu.memory_space<vmem>>, vector<8x128xf32>
    %c0_1 = arith.constant 0 : index
    %c0_2 = arith.constant 0 : index
    %1 = vector.load %arg3[%c0_1, %c0_2] : memref<1x128xf32, #tpu.memory_space<vmem>>, vector<1x128xf32>
    %c0_3 = arith.constant 0 : index
    %c0_4 = arith.constant 0 : index
    %2 = vector.load %arg5[%c0_3, %c0_4] : memref<1x128xf32, #tpu.memory_space<vmem>>, vector<1x128xf32>
    %c0_5 = arith.constant 0 : index
    %c0_6 = arith.constant 0 : index
    %3 = vector.load %arg7[%c0_5, %c0_6] : memref<1x128xf32, #tpu.memory_space<vmem>>, vector<1x128xf32>
    %c0_7 = arith.constant 0 : index
    %c0_8 = arith.constant 0 : index
    %4 = vector.load %arg9[%c0_7, %c0_8] : memref<1x128xf32, #tpu.memory_space<vmem>>, vector<1x128xf32>
    %c0_9 = arith.constant 0 : index
    %c0_10 = arith.constant 0 : index
    %5 = vector.load %arg2[%c0_9, %c0_10] : memref<128x128xf32, #tpu.memory_space<vmem>>, vector<128x128xf32>
    %cst = arith.constant dense<0.000000e+00> : vector<8x128xf32>
    %6 = tpu.matmul %0, %5, %cst {dimension_numbers = #tpu.dot_dimension_numbers<[1], [0], [0], [1], [0, 0, 1, 1], [], []>} : vector<8x128xf32>, vector<128x128xf32>, vector<8x128xf32> -> vector<8x128xf32>
    %7 = vector.broadcast %1 : vector<1x128xf32> to vector<8x128xf32>
    %8 = arith.addf %6, %7 : vector<8x128xf32>
    %cst_11 = arith.constant 0.000000e+00 : f32
    %9 = vector.broadcast %cst_11 : f32 to vector<8x128xf32>
    %10 = arith.maximumf %8, %9 : vector<8x128xf32>
    %c0_12 = arith.constant 0 : index
    %c0_13 = arith.constant 0 : index
    %11 = vector.load %arg4[%c0_12, %c0_13] : memref<128x128xf32, #tpu.memory_space<vmem>>, vector<128x128xf32>
    %cst_14 = arith.constant dense<0.000000e+00> : vector<8x128xf32>
    %12 = tpu.matmul %10, %11, %cst_14 {dimension_numbers = #tpu.dot_dimension_numbers<[1], [0], [0], [1], [0, 0, 1, 1], [], []>} : vector<8x128xf32>, vector<128x128xf32>, vector<8x128xf32> -> vector<8x128xf32>
    %13 = vector.broadcast %2 : vector<1x128xf32> to vector<8x128xf32>
    %14 = arith.addf %12, %13 : vector<8x128xf32>
    %cst_15 = arith.constant 0.000000e+00 : f32
    %15 = vector.broadcast %cst_15 : f32 to vector<8x128xf32>
    %16 = arith.maximumf %14, %15 : vector<8x128xf32>
    %c0_16 = arith.constant 0 : index
    %c0_17 = arith.constant 0 : index
    %17 = vector.load %arg6[%c0_16, %c0_17] : memref<128x128xf32, #tpu.memory_space<vmem>>, vector<128x128xf32>
    %cst_18 = arith.constant dense<0.000000e+00> : vector<8x128xf32>
    %18 = tpu.matmul %16, %17, %cst_18 {dimension_numbers = #tpu.dot_dimension_numbers<[1], [0], [0], [1], [0, 0, 1, 1], [], []>} : vector<8x128xf32>, vector<128x128xf32>, vector<8x128xf32> -> vector<8x128xf32>
    %19 = vector.broadcast %3 : vector<1x128xf32> to vector<8x128xf32>
    %20 = arith.addf %18, %19 : vector<8x128xf32>
    %cst_19 = arith.constant 0.000000e+00 : f32
    %21 = vector.broadcast %cst_19 : f32 to vector<8x128xf32>
    %22 = arith.maximumf %20, %21 : vector<8x128xf32>
    %c0_20 = arith.constant 0 : index
    %c0_21 = arith.constant 0 : index
    %23 = vector.load %arg8[%c0_20, %c0_21] : memref<128x128xf32, #tpu.memory_space<vmem>>, vector<128x128xf32>
    %cst_22 = arith.constant dense<0.000000e+00> : vector<8x128xf32>
    %24 = tpu.matmul %22, %23, %cst_22 {dimension_numbers = #tpu.dot_dimension_numbers<[1], [0], [0], [1], [0, 0, 1, 1], [], []>} : vector<8x128xf32>, vector<128x128xf32>, vector<8x128xf32> -> vector<8x128xf32>
    %25 = vector.broadcast %4 : vector<1x128xf32> to vector<8x128xf32>
    %26 = arith.addf %24, %25 : vector<8x128xf32>
    %27 = arith.negf %26 : vector<8x128xf32>
    %28 = math.exp %27 : vector<8x128xf32>
    %cst_23 = arith.constant 1.000000e+00 : f32
    %29 = vector.broadcast %cst_23 : f32 to vector<8x128xf32>
    %30 = arith.addf %29, %28 : vector<8x128xf32>
    %31 = arith.divf %29, %30 : vector<8x128xf32>
    %c0_24 = arith.constant 0 : index
    %c0_25 = arith.constant 0 : index
    %32 = vector.load %arg10[%c0_24, %c0_25] : memref<8x128xf32, #tpu.memory_space<vmem>>, vector<8x128xf32>
    tpu.vector_store %arg10[%c0_24, %c0_25], %16 {strides = array<i32>} : memref<8x128xf32, #tpu.memory_space<vmem>>, vector<8x128xf32>,
    %c0_26 = arith.constant 0 : index
    %c0_27 = arith.constant 0 : index
    %33 = vector.load %arg11[%c0_26, %c0_27] : memref<8x128xf32, #tpu.memory_space<vmem>>, vector<8x128xf32>
    tpu.vector_store %arg11[%c0_26, %c0_27], %31 {strides = array<i32>} : memref<8x128xf32, #tpu.memory_space<vmem>>, vector<8x128xf32>,
    return
  }
  func.func @transform_0(%arg0: i32) -> (i32, i32) {
    %c0_i32 = arith.constant 0 : i32
    %c0_i32_0 = arith.constant 0 : i32
    return %arg0, %c0_i32 : i32, i32
  }
  func.func @transform_1(%arg0: i32) -> (i32, i32) {
    %c0_i32 = arith.constant 0 : i32
    %c0_i32_0 = arith.constant 0 : i32
    %c0_i32_1 = arith.constant 0 : i32
    return %c0_i32, %c0_i32_0 : i32, i32
  }
  func.func @transform_2(%arg0: i32) -> (i32, i32) {
    %c0_i32 = arith.constant 0 : i32
    %c0_i32_0 = arith.constant 0 : i32
    %c0_i32_1 = arith.constant 0 : i32
    return %c0_i32, %c0_i32_0 : i32, i32
  }
  func.func @transform_3(%arg0: i32) -> (i32, i32) {
    %c0_i32 = arith.constant 0 : i32
    %c0_i32_0 = arith.constant 0 : i32
    %c0_i32_1 = arith.constant 0 : i32
    return %c0_i32, %c0_i32_0 : i32, i32
  }
  func.func @transform_4(%arg0: i32) -> (i32, i32) {
    %c0_i32 = arith.constant 0 : i32
    %c0_i32_0 = arith.constant 0 : i32
    %c0_i32_1 = arith.constant 0 : i32
    return %c0_i32, %c0_i32_0 : i32, i32
  }
  func.func @transform_5(%arg0: i32) -> (i32, i32) {
    %c0_i32 = arith.constant 0 : i32
    %c0_i32_0 = arith.constant 0 : i32
    %c0_i32_1 = arith.constant 0 : i32
    return %c0_i32, %c0_i32_0 : i32, i32
  }
  func.func @transform_6(%arg0: i32) -> (i32, i32) {
    %c0_i32 = arith.constant 0 : i32
    %c0_i32_0 = arith.constant 0 : i32
    %c0_i32_1 = arith.constant 0 : i32
    return %c0_i32, %c0_i32_0 : i32, i32
  }
  func.func @transform_7(%arg0: i32) -> (i32, i32) {
    %c0_i32 = arith.constant 0 : i32
    %c0_i32_0 = arith.constant 0 : i32
    %c0_i32_1 = arith.constant 0 : i32
    return %c0_i32, %c0_i32_0 : i32, i32
  }
  func.func @transform_8(%arg0: i32) -> (i32, i32) {
    %c0_i32 = arith.constant 0 : i32
    %c0_i32_0 = arith.constant 0 : i32
    %c0_i32_1 = arith.constant 0 : i32
    return %c0_i32, %c0_i32_0 : i32, i32
  }
  func.func @transform_9(%arg0: i32) -> (i32, i32) {
    %c0_i32 = arith.constant 0 : i32
    %c0_i32_0 = arith.constant 0 : i32
    return %arg0, %c0_i32 : i32, i32
  }
  func.func @transform_10(%arg0: i32) -> (i32, i32) {
    %c0_i32 = arith.constant 0 : i32
    %c0_i32_0 = arith.constant 0 : i32
    return %arg0, %c0_i32 : i32, i32
  }
}

</mosaic_0001>

<bundles_post_ra>
// kernel: tpu_custom_call.1
= control target key start
LH: loop header
LB: loop body
LE: loop exit
PB: predicated region body
PF: predicated region fallthrough
CT: control target
= control target key end

     0   :  { %16 = vsyncpa [#allocation3], 0  ;;  %s1221_s0 = inlined_call_operand.hbm [shape: f32[8,128], index: 0, kind: input, shape index: {}]   ;;  %s1222_s1 = inlined_call_operand.hbm [shape: f32[128,128], index: 1, kind: input, shape index: {}]   ;;  %s1223_s2 = inlined_call_operand.vmem [shape: f32[1,128], index: 2, kind: input, shape index: {}]   ;;  %s1224_s3 = inlined_call_operand.hbm [shape: f32[128,128], index: 3, kind: input, shape index: {}]   ;;  %s1225_s4 = inlined_call_operand.vmem [shape: f32[1,128], index: 4, kind: input, shape index: {}]   ;;  %s1226_s5 = inlined_call_operand.hbm [shape: f32[128,128], index: 5, kind: input, shape index: {}]   ;;  %s1227_s6 = inlined_call_operand.vmem [shape: f32[1,128], index: 6, kind: input, shape index: {}]   ;;  %s1228_s7 = inlined_call_operand.hbm [shape: f32[128,128], index: 7, kind: input, shape index: {}]   ;;  %s1229_s8 = inlined_call_operand.vmem [shape: f32[1,128], index: 8, kind: input, shape index: {}]   ;;  %s1230_s9 = inlined_call_operand.hbm [shape: f32[8,128], index: 9, kind: output, shape index: {0}]   ;;  %s1231_s10 = inlined_call_operand.hbm [shape: f32[8,128], index: 10, kind: output, shape index: {1}]  }
   0x1   :  { %17 = vsyncpa [#allocation6], 0 }
   0x2   :  { %18 = vsyncpa [#allocation9], 0 }
   0x3   :  { %19 = vsyncpa [#allocation4], 0 }
   0x4   :  { %20 = vsyncpa [#allocation13], 0  ;;  %s1006_s13 = smov [#allocation5]   ;;  %s842_s17 = scalar_lea.hbm %s1222_s1, 2048 }
   0x5   :  { %s36_s14 = sshll.u32 %s1006_s13, 4  ;;  %p843_p0 = scmp.ne.s32.totalorder %s1222_s1, %s842_s17  ;;  %s37_s14 = int_to_ptr.vmem [resolvable:$true] %s36_s14 }
   0x6   :  { %p846_p1 = scmp.lt.u32.totalorder %s842_s17, %s1222_s1 }
   0x8   :  { %p848_p2 = pnand %p846_p1, %p843_p0 }
   0xa   :  { %851 = shalt.err (!%p848_p2)
}
   0xb   :  { %s852_s22 = scalar_lea.vmem %s37_s14, 2048  ;;  %p857_p4 = scmp.lt.s32.totalorder %s37_s14, %s37_s14 }
   0xc   :  { %p853_p3 = scmp.ne.s32.totalorder %s37_s14, %s852_s22  ;;  %p858_p5 = scmp.lt.s32.totalorder %s852_s22, %s852_s22 }
   0xe   :  { %p859_p6 = por %p858_p5, %p857_p4 }
  0x10   :  { %p860_p7 = pnand %p859_p6, %p853_p3 }
  0x12   :  { %863 = shalt.err (!%p860_p7)
}
  0x13   :  { %s1007_s23 = smov 128   ;;  %s1008_s24 = smov 8  }
  0x14   :  { %42 = dma.hbm_to_vmem [thread:$0]  %s1222_s1, 2048, %s37_s14, [#allocation6], %s1007_s23, %s1007_s23, %s1008_s24  }
  0x15   :  { %s1009_s27 = smov [#allocation8]   ;;  %s1010_s29 = smov [#allocation2]  }
  0x16   :  { %s64_s28 = sshll.u32 %s1009_s27, 4  ;;  %s27_s30 = sshll.u32 %s1010_s29, 4  ;;  %s65_s28 = int_to_ptr.vmem [resolvable:$true] %s64_s28  ;;  %s28_s30 = int_to_ptr.vmem [resolvable:$true] %s27_s30 }
  0x17   :  { %s864_s13 = scalar_lea.hbm %s1226_s5, 2048 }
  0x18   :  { %p865_p8 = scmp.ne.s32.totalorder %s1226_s5, %s864_s13  ;;  %p868_p9 = scmp.lt.u32.totalorder %s864_s13, %s1226_s5 }
  0x1a   :  { %p870_p10 = pnand %p868_p9, %p865_p8 }
  0x1c   :  { %873 = shalt.err (!%p870_p10)
}
  0x1d   :  { %s874_s1 = scalar_lea.vmem %s65_s28, 2048  ;;  %p879_p12 = scmp.lt.s32.totalorder %s65_s28, %s65_s28 }
  0x1e   :  { %p875_p11 = scmp.ne.s32.totalorder %s65_s28, %s874_s1  ;;  %p880_p13 = scmp.lt.s32.totalorder %s874_s1, %s874_s1 }
  0x20   :  { %p881_p0 = por %p880_p13, %p879_p12 }
  0x22   :  { %p882_p1 = pnand %p881_p0, %p875_p11 }
  0x24   :  { %885 = shalt.err (!%p882_p1)
}
  0x25   :  { %70 = dma.hbm_to_vmem [thread:$0]  %s1226_s5, 2048, %s65_s28, [#allocation9], %s1007_s23, %s1007_s23, %s1008_s24  }
  0x26   :  { %s886_s22 = scalar_lea.hbm %s1221_s0, 128 }
  0x27   :  { %p887_p2 = scmp.ne.s32.totalorder %s1221_s0, %s886_s22  ;;  %p890_p3 = scmp.lt.u32.totalorder %s886_s22, %s1221_s0 }
  0x29   :  { %p892_p4 = pnand %p890_p3, %p887_p2 }
  0x2b   :  { %895 = shalt.err (!%p892_p4)
}
  0x2c   :  { %s896_s11 = scalar_lea.vmem %s28_s30, 128  ;;  %p901_p6 = scmp.lt.s32.totalorder %s28_s30, %s28_s30 }
  0x2d   :  { %p897_p5 = scmp.ne.s32.totalorder %s28_s30, %s896_s11  ;;  %p902_p7 = scmp.lt.s32.totalorder %s896_s11, %s896_s11 }
  0x2f   :  { %p903_p8 = por %p902_p7, %p901_p6 }
  0x31   :  { %p904_p9 = pnand %p903_p8, %p897_p5 }
  0x33   :  { %907 = shalt.err (!%p904_p9)
}
  0x34   :  { %30 = dma.hbm_to_vmem [thread:$0]  %s1221_s0, 128, %s28_s30, [#allocation3]  }
  0x35   :  { %s1011_s12 = smov [#allocation7]   ;;  %s1012_s15 = smov [#allocation10]  }
  0x36   :  { %s50_s13 = sshll.u32 %s1011_s12, 4  ;;  %s78_s16 = sshll.u32 %s1012_s15, 4  ;;  %s51_s13 = int_to_ptr.vmem [resolvable:$true] %s50_s13  ;;  %s79_s16 = int_to_ptr.vmem [resolvable:$true] %s78_s16 }
  0x37   :  { %s908_s1 = scalar_lea.hbm %s1224_s3, 2048 }
  0x38   :  { %p909_p10 = scmp.ne.s32.totalorder %s1224_s3, %s908_s1  ;;  %p912_p11 = scmp.lt.u32.totalorder %s908_s1, %s1224_s3 }
  0x3a   :  { %p914_p12 = pnand %p912_p11, %p909_p10 }
  0x3c   :  { %917 = shalt.err (!%p914_p12)
}
  0x3d   :  { %s918_s0 = scalar_lea.vmem %s51_s13, 2048  ;;  %p923_p0 = scmp.lt.s32.totalorder %s51_s13, %s51_s13 }
  0x3e   :  { %p919_p13 = scmp.ne.s32.totalorder %s51_s13, %s918_s0  ;;  %p924_p1 = scmp.lt.s32.totalorder %s918_s0, %s918_s0 }
  0x40   :  { %p925_p2 = por %p924_p1, %p923_p0 }
  0x42   :  { %p926_p3 = pnand %p925_p2, %p919_p13 }
  0x44   :  { %929 = shalt.err (!%p926_p3)
}
  0x45   :  { %56 = dma.hbm_to_vmem [thread:$0]  %s1224_s3, 2048, %s51_s13, [#allocation6], %s1007_s23, %s1007_s23, %s1008_s24  }
  0x46   :  { %s930_s27 = scalar_lea.hbm %s1228_s7, 2048 }
  0x47   :  { %p931_p4 = scmp.ne.s32.totalorder %s1228_s7, %s930_s27  ;;  %p934_p5 = scmp.lt.u32.totalorder %s930_s27, %s1228_s7 }
  0x49   :  { %p936_p6 = pnand %p934_p5, %p931_p4 }
  0x4b   :  { %939 = shalt.err (!%p936_p6)
}
  0x4c   :  { %s940_s12 = scalar_lea.vmem %s79_s16, 2048  ;;  %p945_p8 = scmp.lt.s32.totalorder %s79_s16, %s79_s16 }
  0x4d   :  { %p941_p7 = scmp.ne.s32.totalorder %s79_s16, %s940_s12  ;;  %p946_p9 = scmp.lt.s32.totalorder %s940_s12, %s940_s12 }
  0x4f   :  { %p947_p10 = por %p946_p9, %p945_p8 }
  0x51   :  { %p948_p11 = pnand %p947_p10, %p941_p7 }
  0x53   :  { %951 = shalt.err (!%p948_p11)
}
  0x54   :  { %84 = dma.hbm_to_vmem [thread:$0]  %s1228_s7, 2048, %s79_s16, [#allocation9], %s1007_s23, %s1007_s23, %s1008_s24  }
  0x55   :  { %996 = dma.done.wait [#allocation3], 128  }
  0x56   :  { %997 = vsyncadd [#allocation3], 4294967168 }
  0x57   :  { %998 = dma.done.wait [#allocation6], 4096  }
  0x58   :  { %999 = vsyncadd [#allocation6], 4294963200 }
  0x59   :  { %1000 = dma.done.wait [#allocation9], 4096  }
  0x5a   :  { %1001 = vsyncadd [#allocation9], 4294963200  ;;  %v1013_v0 = vmov 0.0|0.0   ;;  %vm1014_vm0 = vmmov 0   ;;  %v1015_v1 = vmov 0.0   ;;  %v107_v2 = vld [vmem:[#allocation5] sm:$0xff] }
  0x5b   :  { %730 = vmatprep.subr.bf16.mxu0 %v1013_v0  ;;  %622 = vmatprep.mubr.msk.f32.mxu0 %vm1014_vm0, %v1015_v1  ;;  %v108_v3 = vld [vmem:[#allocation5 + $0x8] sm:$0xff]  ;;  %v109_v4 = vld [vmem:[#allocation5 + $0x10] sm:$0xff]  ;;  %v110_v6 = vld [vmem:[#allocation5 + $0x18] sm:$0xff] }
  0x5c   :  { %754 = vmatprep.subr.bf16.mxu1 %v1013_v0  ;;  %657 = vmatprep.mubr.msk.f32.mxu1 %vm1014_vm0, %v1015_v1  ;;  %v731_v5 = vpack.c.bf16 %v108_v3, %v107_v2  ;;  %v734_v7 = vpack.c.bf16 %v110_v6, %v109_v4  ;;  %v111_v8 = vld [vmem:[#allocation5 + $0x20] sm:$0xff]  ;;  %v112_v9 = vld [vmem:[#allocation5 + $0x28] sm:$0xff]  ;;  %v202_v12 = vld [vmem:[#allocation7 + $0x10] sm:$0xff] }
  0x5d   :  { %v200_v10 = vld [vmem:[#allocation7] sm:$0xff]  ;;  %v201_v11 = vld [vmem:[#allocation7 + $0x8] sm:$0xff]  ;;  %v203_v13 = vld [vmem:[#allocation7 + $0x18] sm:$0xff]  ;;  %v737_v14 = vpack.c.bf16 %v112_v9, %v111_v8 }
  0x5e   :  { %732 = vmatpush3.bf16.msra.mxu0 %v731_v5  ;;  %v755_v15 = vpack.c.bf16 %v201_v11, %v200_v10  ;;  %v113_v16 = vld [vmem:[#allocation5 + $0x30] sm:$0xff]  ;;  %v114_v17 = vld [vmem:[#allocation5 + $0x38] sm:$0xff]  ;;  %v758_v18 = vpack.c.bf16 %v203_v13, %v202_v12  ;;  %v204_v19 = vld [vmem:[#allocation7 + $0x20] sm:$0xff] }
  0x5f   :  { %733 = vmatprep.subr.bf16.mxu0 %v1013_v0  ;;  %v205_v20 = vld [vmem:[#allocation7 + $0x28] sm:$0xff]  ;;  %v740_v21 = vpack.c.bf16 %v114_v17, %v113_v16  ;;  %v115_v22 = vld [vmem:[#allocation5 + $0x40] sm:$0xff]  ;;  %v206_v25 = vld [vmem:[#allocation7 + $0x30] sm:$0xff] }
  0x60   :  { %756 = vmatpush3.bf16.msra.mxu1 %v755_v15  ;;  %v116_v23 = vld [vmem:[#allocation5 + $0x48] sm:$0xff]  ;;  %v761_v24 = vpack.c.bf16 %v205_v20, %v204_v19  ;;  %v207_v26 = vld [vmem:[#allocation7 + $0x38] sm:$0xff]  ;;  %v117_v28 = vld [vmem:[#allocation5 + $0x50] sm:$0xff] }
  0x61   :  { %757 = vmatprep.subr.bf16.mxu1 %v1013_v0  ;;  %v743_v27 = vpack.c.bf16 %v116_v23, %v115_v22  ;;  %v118_v29 = vld [vmem:[#allocation5 + $0x58] sm:$0xff]  ;;  %v764_v30 = vpack.c.bf16 %v207_v26, %v206_v25  ;;  %v208_v31 = vld [vmem:[#allocation7 + $0x40] sm:$0xff]  ;;  %v209_v32 = vld [vmem:[#allocation7 + $0x48] sm:$0xff] }
  0x62   :  { %735 = vmatpush3.bf16.msra.mxu0 %v734_v7  ;;  %v746_v33 = vpack.c.bf16 %v118_v29, %v117_v28  ;;  %v119_v34 = vld [vmem:[#allocation5 + $0x60] sm:$0xff]  ;;  %v120_v35 = vld [vmem:[#allocation5 + $0x68] sm:$0xff]  ;;  %v767_v36 = vpack.c.bf16 %v209_v32, %v208_v31  ;;  %v210_v37 = vld [vmem:[#allocation7 + $0x50] sm:$0xff] }
  0x63   :  { %736 = vmatprep.subr.bf16.mxu0 %v1013_v0  ;;  %v211_v38 = vld [vmem:[#allocation7 + $0x58] sm:$0xff]  ;;  %v749_v39 = vpack.c.bf16 %v120_v35, %v119_v34  ;;  %v121_v40 = vld [vmem:[#allocation5 + $0x70] sm:$0xff]  ;;  %v212_v43 = vld [vmem:[#allocation7 + $0x60] sm:$0xff] }
  0x64   :  { %759 = vmatpush3.bf16.msra.mxu1 %v758_v18  ;;  %v122_v41 = vld [vmem:[#allocation5 + $0x78] sm:$0xff]  ;;  %v770_v42 = vpack.c.bf16 %v211_v38, %v210_v37  ;;  %v213_v44 = vld [vmem:[#allocation7 + $0x68] sm:$0xff]  ;;  %v214_v48 = vld [vmem:[#allocation7 + $0x70] sm:$0xff] }
  0x65   :  { %760 = vmatprep.subr.bf16.mxu1 %v1013_v0  ;;  %v752_v45 = vpack.c.bf16 %v122_v41, %v121_v40  ;;  %v773_v46 = vpack.c.bf16 %v213_v44, %v212_v43  ;;  %v102_v47 = vld [vmem:[#allocation2] sm:$0xff]  ;;  %v293_v51 = vld [vmem:[#allocation8] sm:$0xff]  ;;  %v294_v52 = vld [vmem:[#allocation8 + $0x8] sm:$0xff] }
  0x66   :  { %738 = vmatpush3.bf16.msra.mxu0 %v737_v14  ;;  %v215_v49 = vld [vmem:[#allocation7 + $0x78] sm:$0xff]  ;;  %v295_v53 = vld [vmem:[#allocation8 + $0x10] sm:$0xff]  ;;  %v779_v54 = vpack.c.bf16 %v294_v52, %v293_v51  ;;  %v297_v57 = vld [vmem:[#allocation8 + $0x20] sm:$0xff] }
  0x67   :  { %739 = vmatprep.subr.bf16.mxu0 %v1013_v0  ;;  %v776_v50 = vpack.c.bf16 %v215_v49, %v214_v48  ;;  %v296_v55 = vld [vmem:[#allocation8 + $0x18] sm:$0xff]  ;;  %v298_v58 = vld [vmem:[#allocation8 + $0x28] sm:$0xff]  ;;  %v299_v60 = vld [vmem:[#allocation8 + $0x30] sm:$0xff] }
  0x68   :  { %762 = vmatpush3.bf16.msra.mxu1 %v761_v24  ;;  %v782_v56 = vpack.c.bf16 %v296_v55, %v295_v53  ;;  %v785_v59 = vpack.c.bf16 %v298_v58, %v297_v57  ;;  %v300_v61 = vld [vmem:[#allocation8 + $0x38] sm:$0xff]  ;;  %v301_v63 = vld [vmem:[#allocation8 + $0x40] sm:$0xff]  ;;  %v302_v2 = vld [vmem:[#allocation8 + $0x48] sm:$0xff] }
  0x69   :  { %763 = vmatprep.subr.bf16.mxu1 %v1013_v0  ;;  %v788_v62 = vpack.c.bf16 %v300_v61, %v299_v60  ;;  %v791_v3 = vpack.c.bf16 %v302_v2, %v301_v63  ;;  %v303_v4 = vld [vmem:[#allocation8 + $0x50] sm:$0xff]  ;;  %v304_v5 = vld [vmem:[#allocation8 + $0x58] sm:$0xff]  ;;  %v305_v7 = vld [vmem:[#allocation8 + $0x60] sm:$0xff] }
  0x6a   :  { %741 = vmatpush3.bf16.msra.mxu0 %v740_v21  ;;  %v794_v6 = vpack.c.bf16 %v304_v5, %v303_v4  ;;  %v306_v8 = vld [vmem:[#allocation8 + $0x68] sm:$0xff]  ;;  %v517_v10 = vld [vmem:[%s1223_s2] ss:$0 sm:$0xff]  ;;  %v307_v15 = vld [vmem:[#allocation8 + $0x70] sm:$0xff] }
  0x6b   :  { %742 = vmatprep.subr.bf16.mxu0 %v1013_v0  ;;  %v797_v9 = vpack.c.bf16 %v306_v8, %v305_v7  ;;  %v308_v16 = vld [vmem:[#allocation8 + $0x78] sm:$0xff]  ;;  %v386_v18 = vld [vmem:[#allocation10] sm:$0xff]  ;;  %v387_v19 = vld [vmem:[#allocation10 + $0x8] sm:$0xff] }
  0x6c   :  { %765 = vmatpush3.bf16.msra.mxu1 %v764_v30  ;;  %v800_v17 = vpack.c.bf16 %v308_v16, %v307_v15  ;;  %v388_v20 = vld [vmem:[#allocation10 + $0x10] sm:$0xff]  ;;  %v803_v21 = vpack.c.bf16 %v387_v19, %v386_v18  ;;  %v389_v22 = vld [vmem:[#allocation10 + $0x18] sm:$0xff]  ;;  %v390_v24 = vld [vmem:[#allocation10 + $0x20] sm:$0xff] }
  0x6d   :  { %766 = vmatprep.subr.bf16.mxu1 %v1013_v0  ;;  %v806_v23 = vpack.c.bf16 %v389_v22, %v388_v20  ;;  %v391_v25 = vld [vmem:[#allocation10 + $0x28] sm:$0xff]  ;;  %v394_v29 = vld [vmem:[#allocation10 + $0x40] sm:$0xff]  ;;  %v396_v32 = vld [vmem:[#allocation10 + $0x50] sm:$0xff] }
  0x6e   :  { %744 = vmatpush3.bf16.msra.mxu0 %v743_v27  ;;  %v809_v26 = vpack.c.bf16 %v391_v25, %v390_v24  ;;  %v393_v27 = vld [vmem:[#allocation10 + $0x38] sm:$0xff]  ;;  %v395_v30 = vld [vmem:[#allocation10 + $0x48] sm:$0xff]  ;;  %v398_v35 = vld [vmem:[#allocation10 + $0x60] sm:$0xff] }
  0x6f   :  { %745 = vmatprep.subr.bf16.mxu0 %v1013_v0  ;;  %v815_v31 = vpack.c.bf16 %v395_v30, %v394_v29  ;;  %v518_v38 = vld [vmem:[%s1225_s4] ss:$0 sm:$0xff]  ;;  %v400_v43 = vld [vmem:[#allocation10 + $0x70] sm:$0xff]  ;;  %s1016_s4 = smov [#allocation11]  }
  0x70   :  { %768 = vmatpush3.bf16.msra.mxu1 %v767_v36  ;;  %v399_v36 = vld [vmem:[#allocation10 + $0x68] sm:$0xff]  ;;  %v401_v44 = vld [vmem:[#allocation10 + $0x78] sm:$0xff]  ;;  %s492_s17 = sshll.u32 %s1016_s4, 4  ;;  %s493_s17 = int_to_ptr.vmem [resolvable:$true] %s492_s17 }
  0x71   :  { %769 = vmatprep.subr.bf16.mxu1 %v1013_v0  ;;  %v821_v37 = vpack.c.bf16 %v399_v36, %v398_v35  ;;  %s952_s18 = scalar_lea.vmem %s493_s17, 128  ;;  %p957_p13 = scmp.lt.s32.totalorder %s493_s17, %s493_s17 }
  0x72   :  { %747 = vmatpush3.bf16.msra.mxu0 %v746_v33  ;;  %v397_v33 = vld [vmem:[#allocation10 + $0x58] sm:$0xff]  ;;  %p953_p12 = scmp.ne.s32.totalorder %s493_s17, %s952_s18  ;;  %p958_p0 = scmp.lt.s32.totalorder %s952_s18, %s952_s18 }
  0x73   :  { %748 = vmatprep.subr.bf16.mxu0 %v1013_v0  ;;  %v818_v34 = vpack.c.bf16 %v397_v33, %v396_v32 }
  0x74   :  { %771 = vmatpush3.bf16.msra.mxu1 %v770_v42  ;;  %p959_p1 = por %p958_p0, %p957_p13 }
  0x75   :  { %772 = vmatprep.subr.bf16.mxu1 %v1013_v0 }
  0x76   :  { %750 = vmatpush3.bf16.msra.mxu0 %v749_v39  ;;  %p960_p2 = pnand %p959_p1, %p953_p12 }
  0x77   :  { %751 = vmatprep.subr.bf16.mxu0 %v1013_v0 }
  0x78   :  { %774 = vmatpush3.bf16.msra.mxu1 %v773_v46  ;;  %v519_v46 = vld [vmem:[%s1227_s6] ss:$0 sm:$0xff] }
  0x79   :  { %775 = vmatprep.subr.bf16.mxu1 %v1013_v0 }
  0x7a   :  { %753 = vmatpush3.bf16.msra.mxu0 %v752_v45  ;;  %v824_v45 = vpack.c.bf16 %v401_v44, %v400_v43 }
  0x7b   :  { %778 = vmatprep.subr.bf16.mxu0 %v1013_v0 }
  0x7c   :  { %777 = vmatpush3.bf16.msra.mxu1 %v776_v50 }
  0x7d   :  { %623 = vmatmul.mubr.f32.vlgmr.msra.gmra.mrb[0].mxu0 %v102_v47  ;;  %802 = vmatprep.subr.bf16.mxu1 %v1013_v0 }
  0x7e   :  { %692 = vmatprep.mubr.msk.f32.mxu0 %vm1014_vm0, %v1015_v1  ;;  %780 = vmatpush3.bf16.msra.mxu0 %v779_v54 }
  0x7f   :  { %781 = vmatprep.subr.bf16.mxu0 %v1013_v0 }
  0x82   :  { %783 = vmatpush3.bf16.msra.mxu0 %v782_v56 }
  0x83   :  { %784 = vmatprep.subr.bf16.mxu0 %v1013_v0 }
  0x86   :  { %786 = vmatpush3.bf16.msra.mxu0 %v785_v59 }
  0x87   :  { %787 = vmatprep.subr.bf16.mxu0 %v1013_v0 }
  0x8a   :  { %789 = vmatpush3.bf16.msra.mxu0 %v788_v62 }
  0x8b   :  { %790 = vmatprep.subr.bf16.mxu0 %v1013_v0 }
  0x8e   :  { %792 = vmatpush3.bf16.msra.mxu0 %v791_v3 }
  0x8f   :  { %793 = vmatprep.subr.bf16.mxu0 %v1013_v0 }
  0x92   :  { %795 = vmatpush3.bf16.msra.mxu0 %v794_v6 }
  0x93   :  { %796 = vmatprep.subr.bf16.mxu0 %v1013_v0 }
  0x96   :  { %798 = vmatpush3.bf16.msra.mxu0 %v797_v9 }
  0x97   :  { %799 = vmatprep.subr.bf16.mxu0 %v1013_v0 }
  0x9a   :  { %801 = vmatpush3.bf16.msra.mxu0 %v800_v17 }
 0x150   :  { %v195_v11 = vpop.f32.mrb[0].mxu0 }
 0x151   :  { %v196_v12 = vadd.f32 %v517_v10, %v195_v11  ;;  %v624_v13 = vpop.f32.mrb[1].mxu0 }
 0x153   :  { %v199_v14 = vmax.f32 %v196_v12, 0.0 }
 0x155   :  { %658 = vmatmul.mubr.f32.vlgmr.msra.gmra.mrb[0].mxu1 %v199_v14 }
 0x156   :  { %727 = vmatprep.mubr.msk.f32.mxu1 %vm1014_vm0, %v1015_v1  ;;  %804 = vmatpush3.bf16.msra.mxu1 %v803_v21  ;;  %v392_v1 = vld [vmem:[#allocation10 + $0x30] sm:$0xff] }
 0x157   :  { %805 = vmatprep.subr.bf16.mxu1 %v1013_v0  ;;  %v812_v28 = vpack.c.bf16 %v393_v27, %v392_v1 }
 0x15a   :  { %807 = vmatpush3.bf16.msra.mxu1 %v806_v23 }
 0x15b   :  { %808 = vmatprep.subr.bf16.mxu1 %v1013_v0 }
 0x15e   :  { %810 = vmatpush3.bf16.msra.mxu1 %v809_v26 }
 0x15f   :  { %811 = vmatprep.subr.bf16.mxu1 %v1013_v0 }
 0x162   :  { %813 = vmatpush3.bf16.msra.mxu1 %v812_v28 }
 0x163   :  { %814 = vmatprep.subr.bf16.mxu1 %v1013_v0 }
 0x166   :  { %816 = vmatpush3.bf16.msra.mxu1 %v815_v31 }
 0x167   :  { %817 = vmatprep.subr.bf16.mxu1 %v1013_v0 }
 0x16a   :  { %819 = vmatpush3.bf16.msra.mxu1 %v818_v34 }
 0x16b   :  { %820 = vmatprep.subr.bf16.mxu1 %v1013_v0 }
 0x16e   :  { %822 = vmatpush3.bf16.msra.mxu1 %v821_v37 }
 0x16f   :  { %823 = vmatprep.subr.bf16.mxu1 %v1013_v0 }
 0x172   :  { %825 = vmatpush3.bf16.msra.mxu1 %v824_v45 }
 0x228   :  { %v288_v39 = vpop.f32.mrb[0].mxu1 }
 0x229   :  { %v289_v40 = vadd.f32 %v518_v38, %v288_v39  ;;  %v659_v41 = vpop.f32.mrb[1].mxu1 }
 0x22b   :  { %v292_v42 = vmax.f32 %v289_v40, 0.0 }
 0x22d   :  { %484 = vst [vmem:[#allocation11] sm:$0xff] %v292_v42  ;;  %693 = vmatmul.mubr.f32.vlgmr.msra.gmra.mrb[2].mxu0 %v292_v42 }
 0x300   :  { %v381_v47 = vpop.f32.mrb[2].mxu0 }
 0x301   :  { %v382_v0 = vadd.f32 %v519_v46, %v381_v47  ;;  %v694_v48 = vpop.f32.mrb[3].mxu0 }
 0x303   :  { %v385_v49 = vmax.f32 %v382_v0, 0.0 }
 0x305   :  { %728 = vmatmul.mubr.f32.vlgmr.msra.gmra.mrb[2].mxu1 %v385_v49 }
 0x306   :  { %963 = shalt.err (!%p960_p2)
}
 0x307   :  { %s964_s19 = scalar_lea.hbm %s1230_s9, 128 }
 0x308   :  { %p965_p3 = scmp.ne.s32.totalorder %s1230_s9, %s964_s19  ;;  %p968_p4 = scmp.lt.u32.totalorder %s964_s19, %s1230_s9 }
 0x30a   :  { %p970_p5 = pnand %p968_p4, %p965_p3 }
 0x30c   :  { %973 = shalt.err (!%p970_p5)
}
 0x30d   :  { %495 = dma.vmem_to_hbm [thread:$0]  %s493_s17, 128, %s1230_s9, [#allocation4]   ;;  %v520_v50 = vld [vmem:[%s1229_s8] ss:$0 sm:$0xff] }
 0x30e   :  { %s1017_s27 = smov [#allocation12]  }
 0x30f   :  { %s502_s29 = sshll.u32 %s1017_s27, 4  ;;  %s503_s29 = int_to_ptr.vmem [resolvable:$true] %s502_s29 }
 0x310   :  { %s974_s11 = scalar_lea.vmem %s503_s29, 128  ;;  %p979_p7 = scmp.lt.s32.totalorder %s503_s29, %s503_s29 }
 0x311   :  { %p975_p6 = scmp.ne.s32.totalorder %s503_s29, %s974_s11  ;;  %p980_p8 = scmp.lt.s32.totalorder %s974_s11, %s974_s11 }
 0x313   :  { %p981_p9 = por %p980_p8, %p979_p7 }
 0x315   :  { %p982_p10 = pnand %p981_p9, %p975_p6 }
 0x3d8   :  { %v474_v51 = vpop.f32.mrb[2].mxu1 }
 0x3d9   :  { %v475_v52 = vadd.f32 %v520_v50, %v474_v51  ;;  %v729_v53 = vpop.f32.mrb[3].mxu1 }
 0x3db   :  { %v521_v54 = vmul.f32 -1.442695, %v475_v52 }
 0x3dd   :  { %838 = vpow2.f32 %v521_v54 }
 0x3e7   :  { %v839_v55 = vpop.eup %838 }
 0x3e8   :  { %v481_v56 = vadd.f32 1.0, %v839_v55 }
 0x3ea   :  { %840 = vrcp.f32 %v481_v56 }
 0x3f4   :  { %v841_v57 = vpop.eup %840 }
 0x3f5   :  { %485 = vst [vmem:[#allocation12] sm:$0xff] %v841_v57 }
 0x3f6   :  { %985 = shalt.err (!%p982_p10)
}
 0x3f7   :  { %s986_s5 = scalar_lea.hbm %s1231_s10, 128 }
 0x3f8   :  { %p987_p11 = scmp.ne.s32.totalorder %s1231_s10, %s986_s5  ;;  %p990_p12 = scmp.lt.u32.totalorder %s986_s5, %s1231_s10 }
 0x3fa   :  { %p992_p13 = pnand %p990_p12, %p987_p11 }
 0x3fc   :  { %995 = shalt.err (!%p992_p13)
}
 0x3fd   :  { %505 = dma.vmem_to_hbm [thread:$0]  %s503_s29, 128, %s1231_s10, [#allocation13]  }
 0x3fe   :  { %1002 = dma.done.wait [#allocation4], 128  }
 0x3ff   :  { %1003 = vsyncadd [#allocation4], 4294967168 }
 0x400   :  { %1004 = dma.done.wait [#allocation13], 128  }
 0x401   :  { %1005 = vsyncadd [#allocation13], 4294967168 }
 0x402   :  { %512 = vsyncpa [#allocation3], 1 }
 0x403   :  { %513 = vsyncpa [#allocation6], 1 }
 0x404   :  { %514 = vsyncpa [#allocation9], 1 }
 0x405   :  { %515 = vsyncpa [#allocation4], 1 }
 0x406   :  { %516 = vsyncpa [#allocation13], 1 }

</bundles_post_ra>
